<compile_context>
chip_gen: v7x
topology: tpu7x:2x2x1
jax: 0.10.0
libtpu: 0.0.40
codegen_flags: <defaults>
</compile_context>

<pallas_src>
import jax
import jax.numpy as jnp
from jax.experimental import pallas as pl
from jax.experimental.pallas import tpu as pltpu


# ----------------------------------------------------------------------------
# Fused Pallas kernel: (x @ W1 + b1) -> ReLU -> (@ W2 + b2) -> ReLU
# ----------------------------------------------------------------------------

def _facegrid_fused_kernel(x_ref, w1_ref, b1_ref, w2_ref, b2_ref, o_ref):
    # Cast activations f32 -> bf16 on the VPU (in-kernel, no extra HBM pass);
    # fc1 on the MXU with f32 accumulation, bias + ReLU on the VPU in f32.
    x = x_ref[...].astype(jnp.bfloat16)
    h = jnp.dot(x, w1_ref[...], preferred_element_type=jnp.float32)
    h = jnp.maximum(h + b1_ref[...], 0.0)
    # fc2: hidden stays on-chip; re-feed the MXU in bf16, accumulate in f32.
    y = jnp.dot(h.astype(jnp.bfloat16), w2_ref[...],
                preferred_element_type=jnp.float32)
    y = jnp.maximum(y + b2_ref[...], 0.0)
    o_ref[...] = y.astype(o_ref.dtype)


# ----------------------------------------------------------------------------
# One-time parameter preparation (hoisted out of the per-forward path)
# ----------------------------------------------------------------------------

def prepare_facegrid_params(params):
    """Transpose/cast weights to MXU layout once; reshape biases once."""
    w1, b1 = params["fc1"]       # torch nn.Linear layout: (128, 625), (128,)
    w2, b2 = params["fc2"]       # torch nn.Linear layout: (16, 128),  (16,)
    return {
        "w1t": jnp.transpose(w1).astype(jnp.bfloat16),        # (K, H) = (625, 128)
        "b1": b1.reshape(1, -1).astype(jnp.float32),           # (1, 128)
        "w2t": jnp.transpose(w2).astype(jnp.bfloat16),        # (H, O) = (128, 16)
        "b2": b2.reshape(1, -1).astype(jnp.float32),           # (1, 16)
    }


def _choose_batch_tile(B, cap=1024):
    """Batch-tile size: one full-batch tile for small B; for large B, >= 2
    near-equal tiles (multiple of 8, <= cap) so v7x's 2 TCs stay balanced."""
    if B <= 256:
        return B                             # full-dim block: no pad/slice copies
    ntiles = 2
    tm = -(-(-(-B // ntiles)) // 8) * 8      # round_up(cdiv(B, ntiles), 8)
    while tm > cap:
        ntiles *= 2
        tm = -(-(-(-B // ntiles)) // 8) * 8
    return tm


# ----------------------------------------------------------------------------
# Forward wrapper
# ----------------------------------------------------------------------------

def face_grid_model(x, prepared):
    """FaceGridModel forward.

    x: (B, gridSize, gridSize) or (B, gridSize**2), f32.
    prepared: output of prepare_facegrid_params (bf16 weights, f32 biases).
    """
    w1t, b1 = prepared["w1t"], prepared["b1"]
    w2t, b2 = prepared["w2t"], prepared["b2"]
    B = x.shape[0]
    K, H = w1t.shape             # 625, 128
    O = w2t.shape[1]             # 16
    xf = x.reshape(B, K)         # == torch .view(B, -1) (layout no-op in XLA)

    tm = _choose_batch_tile(B)
    grid_m = pl.cdiv(B, tm)

    flops = 2 * B * (K * H + H * O)
    bytes_accessed = (B * K * 4                 # x (f32 in HBM)
                      + (K * H + H * O) * 2     # bf16 weights
                      + (H + O) * 4             # f32 biases
                      + B * O * 4)              # f32 output

    out = pl.pallas_call(
        _facegrid_fused_kernel,
        out_shape=jax.ShapeDtypeStruct((B, O), jnp.float32),
        grid_spec=pltpu.PrefetchScalarGridSpec(
            num_scalar_prefetch=0,
            grid=(grid_m,),
            in_specs=[
                pl.BlockSpec((tm, K), lambda i: (i, 0)),   # x tile (f32, cast in-kernel)
                pl.BlockSpec((K, H), lambda i: (0, 0)),    # W1 (VMEM-resident)
                pl.BlockSpec((1, H), lambda i: (0, 0)),    # b1
                pl.BlockSpec((H, O), lambda i: (0, 0)),    # W2 (VMEM-resident)
                pl.BlockSpec((1, O), lambda i: (0, 0)),    # b2
            ],
            out_specs=pl.BlockSpec((tm, O), lambda i: (i, 0)),
        ),
        compiler_params=pltpu.CompilerParams(
            dimension_semantics=("parallel",),
        ),
        cost_estimate=pl.CostEstimate(
            flops=flops, transcendentals=0, bytes_accessed=bytes_accessed),
    )(xf, w1t, b1, w2t, b2)
    return out


# ----------------------------------------------------------------------------
# Pure-JAX f32 reference (for correctness validation)
# ----------------------------------------------------------------------------

def face_grid_model_ref(x, params):
    w1, b1 = params["fc1"]
    w2, b2 = params["fc2"]
    xf = x.reshape(x.shape[0], -1)
    h = jnp.maximum(xf @ w1.T + b1, 0.0)
    return jnp.maximum(h @ w2.T + b2, 0.0)


# ----------------------------------------------------------------------------
# Deterministic parameter init (PyTorch nn.Linear default: U(+-1/sqrt(fan_in)))
# ----------------------------------------------------------------------------

def init_facegrid_params(key, grid_size=25):
    k1, k2, k3, k4 = jax.random.split(key, 4)
    in1 = grid_size * grid_size
    lim1 = 1.0 / float(jnp.sqrt(float(in1)))
    lim2 = 1.0 / float(jnp.sqrt(128.0))
    w1 = jax.random.uniform(k1, (128, in1), jnp.float32, -lim1, lim1)
    b1 = jax.random.uniform(k2, (128,), jnp.float32, -lim1, lim1)
    w2 = jax.random.uniform(k3, (16, 128), jnp.float32, -lim2, lim2)
    b2 = jax.random.uniform(k4, (16,), jnp.float32, -lim2, lim2)
    return {"fc1": (w1, b1), "fc2": (w2, b2)}


if __name__ == "__main__":
    key = jax.random.PRNGKey(0)
    kp, kx1, kx2 = jax.random.split(key, 3)

    grid_size = 25
    params = init_facegrid_params(kp, grid_size)
    prepared = prepare_facegrid_params(params)   # one-time weight prep

    fwd = jax.jit(face_grid_model)

    # Small batch: single full-batch tile path.
    B = 2
    x = jax.random.normal(kx1, (B, grid_size, grid_size), jnp.float32)
    out = jax.block_until_ready(fwd(x, prepared))
    assert out.shape == (B, 16), out.shape
    assert out.dtype == jnp.float32
    ref = face_grid_model_ref(x, params)
    err = float(jnp.max(jnp.abs(out - ref)))
    assert err < 5e-2, f"max abs err {err}"

    # Larger batch: exercises the balanced multi-tile ("parallel") path with a
    # ragged last tile (bf16 MXU operands, f32 accumulation -> loose tol).
    B2 = 300
    x2 = jax.random.normal(kx2, (B2, grid_size, grid_size), jnp.float32)
    out2 = jax.block_until_ready(fwd(x2, prepared))
    ref2 = face_grid_model_ref(x2, params)
    err2 = float(jnp.max(jnp.abs(out2 - ref2)))
    assert out2.shape == (B2, 16)
    assert err2 < 5e-2, f"max abs err {err2}"

    print("KERNEL_OK")
</pallas_src>

<mosaic_0001>
module attributes {stable_mosaic.version = 11 : i64} {
  func.func @_facegrid_fused_kernel(%arg0: i32, %arg1: memref<2x625xf32, #tpu.memory_space<vmem>>, %arg2: memref<625x128xbf16, #tpu.memory_space<vmem>>, %arg3: memref<1x128xf32, #tpu.memory_space<vmem>>, %arg4: memref<128x16xbf16, #tpu.memory_space<vmem>>, %arg5: memref<1x16xf32, #tpu.memory_space<vmem>>, %arg6: memref<2x16xf32, #tpu.memory_space<vmem>>) attributes {dimension_semantics = [#tpu.dimension_semantics<parallel>], iteration_bounds = array<i64: 1>, scalar_prefetch = 0 : i64, scratch_operands = 0 : i64, tpu.core_type = #tpu.core_type<tc>, window_params = [{transform_indices = @transform_0, window_bounds = array<i64: 2, 625>}, {pipeline_mode = #tpu.pipeline_mode<synchronous>, transform_indices = @transform_1, window_bounds = array<i64: 625, 128>}, {pipeline_mode = #tpu.pipeline_mode<synchronous>, transform_indices = @transform_2, window_bounds = array<i64: 1, 128>}, {pipeline_mode = #tpu.pipeline_mode<synchronous>, transform_indices = @transform_3, window_bounds = array<i64: 128, 16>}, {pipeline_mode = #tpu.pipeline_mode<synchronous>, transform_indices = @transform_4, window_bounds = array<i64: 1, 16>}, {transform_indices = @transform_5, window_bounds = array<i64: 2, 16>}]} {
    %c0 = arith.constant 0 : index
    %c0_0 = arith.constant 0 : index
    %0 = vector.load %arg1[%c0, %c0_0] : memref<2x625xf32, #tpu.memory_space<vmem>>, vector<2x625xf32>
    %1 = arith.truncf %0 : vector<2x625xf32> to vector<2x625xbf16>
    %c0_1 = arith.constant 0 : index
    %c0_2 = arith.constant 0 : index
    %2 = vector.load %arg2[%c0_1, %c0_2] : memref<625x128xbf16, #tpu.memory_space<vmem>>, vector<625x128xbf16>
    %cst = arith.constant dense<0.000000e+00> : vector<2x128xf32>
    %3 = tpu.matmul %1, %2, %cst {dimension_numbers = #tpu.dot_dimension_numbers<[1], [0], [0], [1], [0, 0, 1, 1], [], []>} : vector<2x625xbf16>, vector<625x128xbf16>, vector<2x128xf32> -> vector<2x128xf32>
    %c0_3 = arith.constant 0 : index
    %c0_4 = arith.constant 0 : index
    %4 = vector.load %arg3[%c0_3, %c0_4] : memref<1x128xf32, #tpu.memory_space<vmem>>, vector<1x128xf32>
    %5 = vector.broadcast %4 : vector<1x128xf32> to vector<2x128xf32>
    %6 = arith.addf %3, %5 : vector<2x128xf32>
    %cst_5 = arith.constant 0.000000e+00 : f32
    %7 = vector.broadcast %cst_5 : f32 to vector<2x128xf32>
    %8 = arith.maximumf %6, %7 : vector<2x128xf32>
    %9 = arith.truncf %8 : vector<2x128xf32> to vector<2x128xbf16>
    %c0_6 = arith.constant 0 : index
    %c0_7 = arith.constant 0 : index
    %10 = vector.load %arg4[%c0_6, %c0_7] : memref<128x16xbf16, #tpu.memory_space<vmem>>, vector<128x16xbf16>
    %cst_8 = arith.constant dense<0.000000e+00> : vector<2x16xf32>
    %11 = tpu.matmul %9, %10, %cst_8 {dimension_numbers = #tpu.dot_dimension_numbers<[1], [0], [0], [1], [0, 0, 1, 1], [], []>} : vector<2x128xbf16>, vector<128x16xbf16>, vector<2x16xf32> -> vector<2x16xf32>
    %c0_9 = arith.constant 0 : index
    %c0_10 = arith.constant 0 : index
    %12 = vector.load %arg5[%c0_9, %c0_10] : memref<1x16xf32, #tpu.memory_space<vmem>>, vector<1x16xf32>
    %13 = vector.broadcast %12 : vector<1x16xf32> to vector<2x16xf32>
    %14 = arith.addf %11, %13 : vector<2x16xf32>
    %cst_11 = arith.constant 0.000000e+00 : f32
    %15 = vector.broadcast %cst_11 : f32 to vector<2x16xf32>
    %16 = arith.maximumf %14, %15 : vector<2x16xf32>
    %c0_12 = arith.constant 0 : index
    %c0_13 = arith.constant 0 : index
    %17 = vector.load %arg6[%c0_12, %c0_13] : memref<2x16xf32, #tpu.memory_space<vmem>>, vector<2x16xf32>
    tpu.vector_store %arg6[%c0_12, %c0_13], %16 {strides = array<i32>} : memref<2x16xf32, #tpu.memory_space<vmem>>, vector<2x16xf32>,
    return
  }
  func.func @transform_0(%arg0: i32) -> (i32, i32) {
    %c0_i32 = arith.constant 0 : i32
    %c0_i32_0 = arith.constant 0 : i32
    return %arg0, %c0_i32 : i32, i32
  }
  func.func @transform_1(%arg0: i32) -> (i32, i32) {
    %c0_i32 = arith.constant 0 : i32
    %c0_i32_0 = arith.constant 0 : i32
    %c0_i32_1 = arith.constant 0 : i32
    return %c0_i32, %c0_i32_0 : i32, i32
  }
  func.func @transform_2(%arg0: i32) -> (i32, i32) {
    %c0_i32 = arith.constant 0 : i32
    %c0_i32_0 = arith.constant 0 : i32
    %c0_i32_1 = arith.constant 0 : i32
    return %c0_i32, %c0_i32_0 : i32, i32
  }
  func.func @transform_3(%arg0: i32) -> (i32, i32) {
    %c0_i32 = arith.constant 0 : i32
    %c0_i32_0 = arith.constant 0 : i32
    %c0_i32_1 = arith.constant 0 : i32
    return %c0_i32, %c0_i32_0 : i32, i32
  }
  func.func @transform_4(%arg0: i32) -> (i32, i32) {
    %c0_i32 = arith.constant 0 : i32
    %c0_i32_0 = arith.constant 0 : i32
    %c0_i32_1 = arith.constant 0 : i32
    return %c0_i32, %c0_i32_0 : i32, i32
  }
  func.func @transform_5(%arg0: i32) -> (i32, i32) {
    %c0_i32 = arith.constant 0 : i32
    %c0_i32_0 = arith.constant 0 : i32
    return %arg0, %c0_i32 : i32, i32
  }
}

</mosaic_0001>

<bundles_post_ra>
// kernel: face_grid_model.1
= control target key start
LH: loop header
LB: loop body
LE: loop exit
PB: predicated region body
PF: predicated region fallthrough
CT: control target
= control target key end

     0   :  { %10 = vsyncpa [#allocation3], 0  ;;  %s1033_s0 = inlined_call_operand.vmem [shape: f32[2,625], index: 0, kind: input, shape index: {}]   ;;  %s1034_s1 = inlined_call_operand.hbm [shape: bf16[625,128], index: 1, kind: input, shape index: {}]   ;;  %s1035_s2 = inlined_call_operand.vmem [shape: f32[1,128], index: 2, kind: input, shape index: {}]   ;;  %s1036_s3 = inlined_call_operand.vmem [shape: bf16[128,16], index: 3, kind: input, shape index: {}]   ;;  %s1037_s4 = inlined_call_operand.vmem [shape: f32[1,16], index: 4, kind: input, shape index: {}]   ;;  %s1038_s5 = inlined_call_operand.hbm [shape: f32[2,16], index: 5, kind: output, shape index: {}]  }
   0x1   :  { %11 = vsyncpa [#allocation4], 0  ;;  %s917_s18 = smov [#allocation2]   ;;  %s869_s22 = scalar_lea.hbm %s1034_s1, 5056 }
   0x2   :  { %s19_s19 = sshll.u32 %s917_s18, 4  ;;  %p870_p0 = scmp.ne.s32.totalorder %s1034_s1, %s869_s22  ;;  %s20_s19 = int_to_ptr.vmem [resolvable:$true] %s19_s19 }
   0x3   :  { %p873_p1 = scmp.lt.u32.totalorder %s869_s22, %s1034_s1 }
   0x5   :  { %p875_p2 = pnand %p873_p1, %p870_p0 }
   0x7   :  { %878 = shalt.err (!%p875_p2)
}
   0x8   :  { %s879_s27 = scalar_lea.vmem %s20_s19, 5056  ;;  %p884_p4 = scmp.lt.s32.totalorder %s20_s19, %s20_s19 }
   0x9   :  { %p880_p3 = scmp.ne.s32.totalorder %s20_s19, %s879_s27  ;;  %p885_p5 = scmp.lt.s32.totalorder %s879_s27, %s879_s27 }
   0xb   :  { %p886_p6 = por %p885_p5, %p884_p4 }
   0xd   :  { %p887_p7 = pnand %p886_p6, %p880_p3 }
   0xf   :  { %890 = shalt.err (!%p887_p7)
}
  0x10   :  { %s918_s28 = smov 64   ;;  %s919_s29 = smov 4  }
  0x11   :  { %25 = dma.hbm_to_vmem [thread:$0]  %s1034_s1, 5056, %s20_s19, [#allocation3], %s918_s28, %s918_s28, %s919_s29  }
  0x12   :  { %913 = dma.done.wait [#allocation3], 5056  }
  0x13   :  { %914 = vsyncadd [#allocation3], 4294962240  ;;  %v820_v0 = vld [vmem:[#allocation2 + $0x40] sm:$0xff]   ;;  %v824_v4 = vld [vmem:[#allocation2 + $0x48] sm:$0xff]   ;;  %v920_v21 = vmov 1983009808   ;;  %v44_v23 = vlaneseq }
  0x14   :  { %v821_v1 = vld [vmem:[#allocation2] sm:$0xff]   ;;  %710 = vmatprep.subr.bf16.mxu0 %v820_v0  ;;  %v825_v5 = vld [vmem:[#allocation2 + $0x8] sm:$0xff]   ;;  %v828_v8 = vld [vmem:[#allocation2 + $0x50] sm:$0xff]   ;;  %v42_v22 = vunpack.c.l.s4 %v920_v21  ;;  %v921_v40 = vmov 0.0   ;;  %vm922_vm0 = vmmov 0   ;;  %vm401_vm1 = vcmask 1040384  }
  0x15   :  { %v822_v2 = vld [vmem:[#allocation2 + $0xc0] sm:$0xff]   ;;  %711 = vmatpush3.bf16.msra.mxu0 %v821_v1  ;;  %v826_v6 = vld [vmem:[#allocation2 + $0xc8] sm:$0xff]   ;;  %v829_v9 = vld [vmem:[#allocation2 + $0x10] sm:$0xff]   ;;  %v45_v29 = vshrl.u32 %v44_v23, 7  ;;  %v923_v57 = vmov 0   ;;  %vm397_vm2 = vcmask 924672  }
  0x16   :  { %v823_v3 = vld [vmem:[#allocation2 + $0x80] sm:$0xff]   ;;  %732 = vmatprep.subr.bf16.mxu1 %v822_v2  ;;  %712 = vmatprep.subr.bf16.mxu0 %v824_v4  ;;  %v827_v7 = vld [vmem:[#allocation2 + $0x88] sm:$0xff]   ;;  %v830_v10 = vld [vmem:[#allocation2 + $0xd0] sm:$0xff]   ;;  %v43_v28 = vunpack.c.0.s8 %v42_v22  ;;  %v403_v58 = vsel %vm401_vm1, 65535, %v923_v57  ;;  %s924_s27 = smov [#allocation5]   ;;  %vm641_vm3 = vcmask 123904  }
  0x17   :  { %733 = vmatpush3.bf16.msra.mxu1 %v823_v3  ;;  %v831_v11 = vld [vmem:[#allocation2 + $0x90] sm:$0xff]   ;;  %v832_v12 = vld [vmem:[#allocation2 + $0x58] sm:$0xff]   ;;  %v836_v16 = vld [vmem:[#allocation2 + $0x60] sm:$0xff]   ;;  %s649_s28 = sshll.u32 %s924_s27, 4  ;;  %s650_s28 = int_to_ptr.vmem [resolvable:$true] %s649_s28 }
  0x18   :  { %734 = vmatprep.subr.bf16.mxu1 %v826_v6  ;;  %v833_v13 = vld [vmem:[#allocation2 + $0x18] sm:$0xff]   ;;  %v837_v17 = vld [vmem:[#allocation2 + $0x20] sm:$0xff]   ;;  %v840_v20 = vld [vmem:[#allocation2 + $0x68] sm:$0xff]   ;;  %v46_v34 = vsub.s32 %v43_v28, %v45_v29  ;;  %s891_s29 = scalar_lea.vmem %s650_s28, 32  ;;  %p896_p9 = scmp.lt.s32.totalorder %s650_s28, %s650_s28 }
  0x19   :  { %713 = vmatpush3.bf16.msra.mxu0 %v825_v5  ;;  %v834_v14 = vld [vmem:[#allocation2 + $0xd8] sm:$0xff]   ;;  %v838_v18 = vld [vmem:[#allocation2 + $0xe0] sm:$0xff]   ;;  %v841_v24 = vld [vmem:[#allocation2 + $0x28] sm:$0xff]   ;;  %p892_p8 = scmp.ne.s32.totalorder %s650_s28, %s891_s29  ;;  %p897_p10 = scmp.lt.s32.totalorder %s891_s29, %s891_s29 }
  0x1a   :  { %714 = vmatprep.subr.bf16.mxu0 %v828_v8  ;;  %v835_v15 = vld [vmem:[#allocation2 + $0x98] sm:$0xff]   ;;  %v839_v19 = vld [vmem:[#allocation2 + $0xa0] sm:$0xff]   ;;  %v842_v25 = vld [vmem:[#allocation2 + $0xe8] sm:$0xff]  }
  0x1b   :  { %735 = vmatpush3.bf16.msra.mxu1 %v827_v7  ;;  %v843_v26 = vld [vmem:[#allocation2 + $0xa8] sm:$0xff]   ;;  %v844_v27 = vld [vmem:[#allocation2 + $0x70] sm:$0xff]   ;;  %v848_v33 = vld [vmem:[#allocation2 + $0x78] sm:$0xff]   ;;  %p898_p11 = por %p897_p10, %p896_p9 }
  0x1c   :  { %736 = vmatprep.subr.bf16.mxu1 %v830_v10  ;;  %v845_v30 = vld [vmem:[#allocation2 + $0x30] sm:$0xff]   ;;  %v849_v35 = vld [vmem:[#allocation2 + $0x38] sm:$0xff]   ;;  %v36_v37 = vld [vmem:[%s1033_s0] sm:$0xff] }
  0x1d   :  { %715 = vmatpush3.bf16.msra.mxu0 %v829_v9  ;;  %v846_v31 = vld [vmem:[#allocation2 + $0xf0] sm:$0xff]   ;;  %v850_v36 = vld [vmem:[#allocation2 + $0xf8] sm:$0xff]   ;;  %v47_v38 = vrot.slane %v36_v37, %v46_v34  ;;  %v40_v41 = vcombine.high %v36_v37, %v36_v37  ;;  %v853_v47 = vld [vmem:[#allocation2 + $0x100] sm:$0xff]   ;;  %p899_p12 = pnand %p898_p11, %p892_p8 }
  0x1e   :  { %716 = vmatprep.subr.bf16.mxu0 %v832_v12  ;;  %v847_v32 = vld [vmem:[#allocation2 + $0xb0] sm:$0xff]   ;;  %v851_v39 = vld [vmem:[#allocation2 + $0xb8] sm:$0xff]   ;;  %v854_v50 = vld [vmem:[#allocation2 + $0x108] sm:$0xff]  }
  0x1f   :  { %737 = vmatpush3.bf16.msra.mxu1 %v831_v11  ;;  %v55_v42 = vcombine.high %v47_v38, %v47_v38  ;;  %v54_v43 = vrot.slane %v40_v41, %v46_v34  ;;  %v69_v44 = vpack.c.bf16 %v47_v38, %v47_v38  ;;  %v855_v51 = vld [vmem:[#allocation2 + $0x110] sm:$0xff]   ;;  %v856_v52 = vld [vmem:[#allocation2 + $0x118] sm:$0xff]   ;;  %v857_v53 = vld [vmem:[#allocation2 + $0x120] sm:$0xff]  }
  0x20   :  { %738 = vmatprep.subr.bf16.mxu1 %v834_v14  ;;  %v858_v54 = vld [vmem:[#allocation2 + $0x128] sm:$0xff]   ;;  %v859_v55 = vld [vmem:[#allocation2 + $0x130] sm:$0xff]   ;;  %v860_v56 = vld [vmem:[#allocation2 + $0x138] ss:$0 sps:$4 sm:$0x11]  }
  0x21   :  { %717 = vmatpush3.bf16.msra.mxu0 %v833_v13  ;;  %v70_v45 = vpack.c.bf16 %v55_v42, %v55_v42  ;;  %v56_v46 = vcombine.high %v54_v43, %v54_v43  ;;  %v71_v48 = vpack.c.bf16 %v54_v43, %v54_v43  ;;  %v405_v59 = vand.u32 %v860_v56, %v403_v58  ;;  %v658_v60 = vld.sshfl [vmem:[%s1033_s0 + $0x8] sm:$0x3 pattern:$0x76325410]  ;;  %v861_v62 = vld [vmem:[%s1036_s3] sm:$0xff]   ;;  %v863_v0 = vld [vmem:[%s1036_s3 + $0x10] sm:$0xff]  }
  0x22   :  { %718 = vmatprep.subr.bf16.mxu0 %v836_v16  ;;  %v73_v61 = vpack.c.bf16 %v658_v60, %v658_v60  ;;  %v862_v63 = vld [vmem:[%s1036_s3 + $0x8] sm:$0xff]   ;;  %v864_v1 = vld [vmem:[%s1036_s3 + $0x18] sm:$0xff]   ;;  %v865_v2 = vld [vmem:[%s1036_s3 + $0x20] sm:$0xff]  }
  0x23   :  { %739 = vmatpush3.bf16.msra.mxu1 %v835_v15  ;;  %439 = vmatprep.mubr.bf16.mxu0 %v70_v45  ;;  %v72_v49 = vpack.c.bf16 %v56_v46, %v56_v46  ;;  %v866_v3 = vld [vmem:[%s1036_s3 + $0x28] sm:$0xff]   ;;  %v867_v4 = vld [vmem:[%s1036_s3 + $0x30] sm:$0xff]   ;;  %v868_v5 = vld [vmem:[%s1036_s3 + $0x38] sm:$0xff]  }
  0x24   :  { %740 = vmatprep.subr.bf16.mxu1 %v838_v18  ;;  %v659_v7 = vld [vmem:[%s1035_s2] ss:$0 sm:$0xff] }
  0x25   :  { %719 = vmatpush3.bf16.msra.mxu0 %v837_v17  ;;  %479 = vmatprep.mubr.bf16.mxu1 %v72_v49 }
  0x26   :  { %720 = vmatprep.subr.bf16.mxu0 %v840_v20 }
  0x27   :  { %741 = vmatpush3.bf16.msra.mxu1 %v839_v19 }
  0x28   :  { %742 = vmatprep.subr.bf16.mxu1 %v842_v25 }
  0x29   :  { %721 = vmatpush3.bf16.msra.mxu0 %v841_v24 }
  0x2a   :  { %722 = vmatprep.subr.bf16.mxu0 %v844_v27 }
  0x2b   :  { %743 = vmatpush3.bf16.msra.mxu1 %v843_v26  ;;  %v701_v26 = vld [vmem:[%s1037_s4] ss:$0 sm:$0xff] }
  0x2c   :  { %744 = vmatprep.subr.bf16.mxu1 %v846_v31 }
  0x2d   :  { %723 = vmatpush3.bf16.msra.mxu0 %v845_v30 }
  0x2e   :  { %724 = vmatprep.subr.bf16.mxu0 %v848_v33 }
  0x2f   :  { %745 = vmatpush3.bf16.msra.mxu1 %v847_v32 }
  0x30   :  { %746 = vmatprep.subr.bf16.mxu1 %v850_v36 }
  0x31   :  { %725 = vmatpush3.bf16.msra.mxu0 %v849_v35 }
  0x32   :  { %772 = vmatprep.subr.bf16.mxu0 %v921_v40 }
  0x33   :  { %747 = vmatpush3.bf16.msra.mxu1 %v851_v39 }
  0x34   :  { %792 = vmatprep.subr.bf16.mxu1 %v921_v40  ;;  %440 = vmatmul.mubr.bf16.vlgmr.msra.gmra.mrb[0].mxu0 %v69_v44 }
  0x35   :  { %773 = vmatpush3.bf16.msra.mxu0 %v853_v47  ;;  %788 = vmatprep.mubr.msk.bf16.mxu0 %vm922_vm0, %v921_v40 }
  0x36   :  { %480 = vmatmul.mubr.bf16.vlgmr.msra.gmra.mrb[0].mxu1 %v71_v48  ;;  %774 = vmatprep.subr.bf16.mxu0 %v921_v40 }
  0x37   :  { %808 = vmatprep.mubr.msk.bf16.mxu1 %vm922_vm0, %v921_v40  ;;  %793 = vmatpush3.bf16.msra.mxu1 %v861_v62 }
  0x38   :  { %794 = vmatprep.subr.bf16.mxu1 %v921_v40 }
  0x39   :  { %775 = vmatpush3.bf16.msra.mxu0 %v854_v50 }
  0x3a   :  { %776 = vmatprep.subr.bf16.mxu0 %v921_v40 }
  0x3b   :  { %795 = vmatpush3.bf16.msra.mxu1 %v862_v63 }
  0x3c   :  { %796 = vmatprep.subr.bf16.mxu1 %v921_v40 }
  0x3d   :  { %777 = vmatpush3.bf16.msra.mxu0 %v855_v51 }
  0x3e   :  { %778 = vmatprep.subr.bf16.mxu0 %v921_v40 }
  0x3f   :  { %797 = vmatpush3.bf16.msra.mxu1 %v863_v0 }
  0x40   :  { %798 = vmatprep.subr.bf16.mxu1 %v921_v40 }
  0x41   :  { %779 = vmatpush3.bf16.msra.mxu0 %v856_v52 }
  0x42   :  { %780 = vmatprep.subr.bf16.mxu0 %v921_v40 }
  0x43   :  { %799 = vmatpush3.bf16.msra.mxu1 %v864_v1 }
  0x44   :  { %800 = vmatprep.subr.bf16.mxu1 %v921_v40 }
  0x45   :  { %781 = vmatpush3.bf16.msra.mxu0 %v857_v53 }
  0x46   :  { %782 = vmatprep.subr.bf16.mxu0 %v921_v40 }
  0x47   :  { %801 = vmatpush3.bf16.msra.mxu1 %v865_v2 }
  0x48   :  { %802 = vmatprep.subr.bf16.mxu1 %v921_v40 }
  0x49   :  { %783 = vmatpush3.bf16.msra.mxu0 %v858_v54 }
  0x4a   :  { %784 = vmatprep.subr.bf16.mxu0 %v921_v40 }
  0x4b   :  { %803 = vmatpush3.bf16.msra.mxu1 %v866_v3 }
  0x4c   :  { %804 = vmatprep.subr.bf16.mxu1 %v921_v40 }
  0x4d   :  { %785 = vmatpush3.bf16.msra.mxu0 %v859_v55 }
  0x4e   :  { %786 = vmatprep.subr.bf16.mxu0 %v921_v40 }
  0x4f   :  { %805 = vmatpush3.bf16.msra.mxu1 %v867_v4 }
  0x50   :  { %806 = vmatprep.subr.bf16.mxu1 %v921_v40 }
  0x51   :  { %787 = vmatpush3.bf16.msra.mxu0 %v405_v59 }
  0x53   :  { %807 = vmatpush3.bf16.msra.mxu1 %v868_v5 }
  0x54   :  { %789 = vmatmul.mubr.msk.bf16.vlgmr.msra.gmra.mrb[4].mxu0 %vm397_vm2, %v73_v61 }
 0x107   :  { %v726_v6 = vpop.f32.mrb[0].mxu0 }
 0x108   :  { %v727_v8 = vpop.f32.mrb[1].mxu0 }
 0x109   :  { %v728_v9 = vadd.f32 %v727_v8, %v726_v6  ;;  %v729_v10 = vpop.f32.mrb[2].mxu0  ;;  %v748_v11 = vpop.f32.mrb[0].mxu1 }
 0x10a   :  { %v730_v12 = vpop.f32.mrb[3].mxu0  ;;  %v749_v13 = vpop.f32.mrb[1].mxu1 }
 0x10b   :  { %v442_v14 = vadd.f32 %v728_v9, %v659_v7  ;;  %v750_v15 = vadd.f32 %v749_v13, %v748_v11  ;;  %v751_v16 = vpop.f32.mrb[2].mxu1 }
 0x10c   :  { %v752_v17 = vpop.f32.mrb[3].mxu1 }
 0x10d   :  { %v482_v18 = vadd.f32 %v750_v15, %v442_v14 }
 0x127   :  { %v521_v19 = vpop.f32.mrb[4].mxu0 }
 0x128   :  { %v522_v20 = vadd.f32 %v521_v19, %v482_v18  ;;  %v790_v21 = vpop.f32.mrb[5].mxu0 }
 0x129   :  { %v524_v22 = vpop.f32.mrb[6].mxu0 }
 0x12a   :  { %v527_v23 = vmax.f32 %v522_v20, 0.0  ;;  %v791_v24 = vpop.f32.mrb[7].mxu0 }
 0x12c   :  { %v528_v25 = vpack.c.bf16 %v527_v23, %v527_v23 }
 0x12e   :  { %809 = vmatmul.mubr.bf16.vlgmr.msra.gmra.mrb[4].mxu1 %v528_v25 }
 0x201   :  { %v634_v27 = vpop.f32.mrb[4].mxu1 }
 0x202   :  { %v635_v28 = vadd.f32 %v701_v26, %v634_v27  ;;  %v810_v29 = vpop.f32.mrb[5].mxu1 }
 0x203   :  { %v637_v30 = vpop.f32.mrb[6].mxu1 }
 0x204   :  { %v640_v31 = vmax.f32 %v635_v28, 0.0  ;;  %v811_v32 = vpop.f32.mrb[7].mxu1 }
 0x206   :  { %642 = vst.msk [vmem:[#allocation5] sm:$0x3] %vm641_vm3, %v640_v31 }
 0x207   :  { %902 = shalt.err (!%p899_p12)
}
 0x208   :  { %s903_s6 = scalar_lea.hbm %s1038_s5, 32 }
 0x209   :  { %p904_p13 = scmp.ne.s32.totalorder %s1038_s5, %s903_s6  ;;  %p907_p0 = scmp.lt.u32.totalorder %s903_s6, %s1038_s5 }
 0x20b   :  { %p909_p1 = pnand %p907_p0, %p904_p13 }
 0x20d   :  { %912 = shalt.err (!%p909_p1)
}
 0x20e   :  { %652 = dma.vmem_to_hbm [thread:$0]  %s650_s28, 32, %s1038_s5, [#allocation4]  }
 0x20f   :  { %915 = dma.done.wait [#allocation4], 32  }
 0x210   :  { %916 = vsyncadd [#allocation4], 4294967264 }
 0x211   :  { %656 = vsyncpa [#allocation3], 1 }
 0x212   :  { %657 = vsyncpa [#allocation4], 1 }

</bundles_post_ra>
